<compile_context>
chip_gen: v7x
topology: tpu7x:2x2x1
jax: 0.10.0
libtpu: 0.0.40
codegen_flags: <defaults>
</compile_context>

<pallas_src>
import functools
import math

import numpy as np
import jax
import jax.numpy as jnp
from jax.experimental import pallas as pl
from jax.experimental.pallas import tpu as pltpu

NC = 1
NDF = 8
IMAGE_SIZE = 16
BATCH = 2
LEAKY_SLOPE = 0.2
BN_EPS = 1e-5


# ---------------------------------------------------------------------------
# Fused Pallas kernel: all convs (as flat dense matmuls) + BN + activations
# ---------------------------------------------------------------------------
def _fused_netD_kernel(*refs, meta):
    """refs = (x, [per-layer weights...], out).

    meta: static tuple of (act, has_bn) per conv layer. Per-layer inputs:
      w_dense (K, N) bf16 always; if has_bn also
        msum  (N, C)  bf16  -- channel-sum selector pre-scaled by 1/(B*H*W)
        msumT (C, N)  f32   -- 0/1 per-channel broadcast-back matrix
        gamma (1, C)  f32
        beta  (1, C)  f32
    Every intermediate stays in VMEM/vregs; only the final (B, 128) is stored.
    """
    in_refs, o_ref = refs[:-1], refs[-1]
    idx = 0
    y = in_refs[idx][...].astype(jnp.float32)         # (B, K) flattened input
    idx += 1

    for act, has_bn in meta:
        w = in_refs[idx][...]                          # (K, N) bf16
        idx += 1
        y = jnp.dot(y.astype(jnp.bfloat16), w,
                    preferred_element_type=jnp.float32)            # MXU, f32 acc

        if has_bn:
            msum = in_refs[idx][...]       # (N, C) bf16, value 1/(B*HW) at taps
            msumt = in_refs[idx + 1][...]  # (C, N) f32 0/1 broadcast-back
            gamma = in_refs[idx + 2][...]  # (1, C) f32
            beta = in_refs[idx + 3][...]   # (1, C) f32
            idx += 4

            # Training-mode BatchNorm2d (biased batch variance), one-pass form.
            # The two stats matmuls are independent -> issue back to back.
            yb = y.astype(jnp.bfloat16)
            ysq = (y * y).astype(jnp.bfloat16)
            mean = jnp.sum(jnp.dot(yb, msum, preferred_element_type=jnp.float32),
                           axis=0, keepdims=True)                  # (1, C)
            ex2 = jnp.sum(jnp.dot(ysq, msum, preferred_element_type=jnp.float32),
                          axis=0, keepdims=True)                   # (1, C)
            var = ex2 - mean * mean
            inv_std = jax.lax.rsqrt(var + BN_EPS)                  # EUP rsqrt
            s = gamma * inv_std                                    # (1, C)
            t = beta - s * mean                                    # (1, C)
            # Two independent broadcast-back matmuls (same MXU stage); avoids
            # an in-kernel concatenate while keeping the chain at 2 stages.
            s_b = jnp.dot(s, msumt, preferred_element_type=jnp.float32)  # (1, N)
            t_b = jnp.dot(t, msumt, preferred_element_type=jnp.float32)  # (1, N)
            y = y * s_b + t_b

        if act == "leaky":
            y = jnp.maximum(y, LEAKY_SLOPE * y)
        elif act == "sigmoid":
            # Exact divide keeps the numerical self-check tight; with larger
            # shapes pl.reciprocal(..., approx=True) moves this onto the EUP.
            y = 1.0 / (1.0 + jnp.exp(-y))

    o_ref[...] = y.astype(o_ref.dtype)                 # lane-dense (B, 128)


# ---------------------------------------------------------------------------
# One-time weight prep (outside the hot path)
# ---------------------------------------------------------------------------
def _conv_to_dense(w_oihw, hin, win, stride, pad, input_layout="nhwc"):
    """PyTorch OIHW conv weight -> dense (Hin*Win*Cin, Ho*Wo*Cout) matrix that
    maps the flattened layer input directly to the flattened NHWC layer output
    (zero padding folded in as omitted taps).  `input_layout` selects whether
    the rows are ordered for an NHWC-flattened or NCHW-flattened input, which
    lets the first layer absorb the NCHW->NHWC permutation for free."""
    w = np.asarray(w_oihw, dtype=np.float32)
    cout, cin, kh, kw = w.shape
    ho = (hin + 2 * pad - kh) // stride + 1
    wo = (win + 2 * pad - kw) // stride + 1
    big = np.zeros((hin, win, cin, ho, wo, cout), np.float32)
    for i in range(kh):
        for j in range(kw):
            tap = w[:, :, i, j].T                      # (Cin, Cout)
            for oh in range(ho):
                hh = oh * stride + i - pad
                if hh < 0 or hh >= hin:
                    continue
                for ow in range(wo):
                    ww = ow * stride + j - pad
                    if ww < 0 or ww >= win:
                        continue
                    # (i, j) is unique per (hh, ww, oh, ow): plain assignment.
                    big[hh, ww, :, oh, ow, :] = tap
    if input_layout == "nchw":
        big = big.transpose(2, 0, 1, 3, 4, 5)          # rows in (C, H, W) order
    return big.reshape(hin * win * cin, ho * wo * cout), ho, wo


def prepare_netD(params, image_size=IMAGE_SIZE, nc=NC, batch=BATCH):
    """Lower every conv to a dense flat->flat matmul matrix (bf16) and build
    the BN helper matrices.  Returns (weights, meta):
      weights: flat tuple of arrays in kernel-input order
      meta:    (baked_batch, per-layer (act, has_bn)) -- static/hashable."""
    weights = []
    layer_meta = []
    h = w_sp = image_size
    c = nc
    state = {"first": True}

    def add_conv(w_oihw, stride, pad, act, bn_params, pad_out_to=None):
        nonlocal h, w_sp, c
        assert int(w_oihw.shape[1]) == c
        dense, ho, wo = _conv_to_dense(
            w_oihw, h, w_sp, stride, pad,
            input_layout="nchw" if state["first"] else "nhwc")
        state["first"] = False
        cout = int(w_oihw.shape[0])
        if pad_out_to is not None and dense.shape[1] < pad_out_to:
            # Lane-dense final layer: result lives in column 0, rest are zeros.
            dense = np.concatenate(
                [dense, np.zeros((dense.shape[0], pad_out_to - dense.shape[1]),
                                 np.float32)], axis=1)
        weights.append(jnp.asarray(dense, dtype=jnp.bfloat16))
        hw = ho * wo
        if bn_params is not None:
            gamma, beta = bn_params
            inv_n = 1.0 / (batch * hw)   # exactly representable (power of 2 here)
            q = np.arange(hw * cout)
            msum = np.zeros((hw * cout, cout), np.float32)
            msum[q, q % cout] = inv_n                  # channel-mean selector
            msumt = np.zeros((cout, hw * cout), np.float32)
            msumt[q % cout, q] = 1.0                   # per-channel broadcast-back
            weights.append(jnp.asarray(msum, dtype=jnp.bfloat16))
            weights.append(jnp.asarray(msumt, dtype=jnp.float32))
            weights.append(jnp.asarray(np.asarray(gamma, np.float32).reshape(1, -1)))
            weights.append(jnp.asarray(np.asarray(beta, np.float32).reshape(1, -1)))
            layer_meta.append((act, True))
        else:
            layer_meta.append((act, False))
        h, w_sp, c = ho, wo, cout

    add_conv(params["conv_in"], 2, 1, "leaky", None)
    for (wt, gamma, beta) in params["pyramid"]:
        add_conv(wt, 2, 1, "leaky", (gamma, beta))
    add_conv(params["conv_out"], 1, 0, "sigmoid", None, pad_out_to=128)
    assert h == 1 and w_sp == 1 and c == 1
    return tuple(weights), (batch, tuple(layer_meta))


# ---------------------------------------------------------------------------
# Forward pass (single fused pallas_call)
# ---------------------------------------------------------------------------
@functools.partial(jax.jit, static_argnames=("meta",))
def netD_forward(x_nchw, weights, meta):
    baked_batch, layer_meta = meta
    B, C, H, W = x_nchw.shape
    assert B == baked_batch, "batch baked into BN prep differs from runtime batch"
    # Only non-kernel op: a free reshape (the NCHW row order is folded into the
    # first dense conv matrix, so no transpose is needed).
    x = x_nchw.reshape(B, C * H * W).astype(jnp.float32)
    inputs = [x] + list(weights)

    # Advisory cost estimate so XLA does not over-schedule around the call.
    flops, trans, k = 0, 0, int(x.shape[1])
    wi = 0
    for act, has_bn in layer_meta:
        n = int(weights[wi].shape[1]); wi += 1
        flops += 2 * B * k * n
        if has_bn:
            cout = int(weights[wi].shape[1]); wi += 4
            flops += 2 * (2 * B * n * cout) + 2 * (2 * cout * n) + 8 * B * n
            trans += cout                   # rsqrt
        if act == "sigmoid":
            trans += B * n                  # exp
        flops += 2 * B * n                  # activation
        k = n
    bytes_accessed = (x.size * x.dtype.itemsize
                      + sum(int(np.prod(wt.shape)) * wt.dtype.itemsize
                            for wt in weights)
                      + B * 128 * 4)

    kernel = functools.partial(_fused_netD_kernel, meta=layer_meta)
    out = pl.pallas_call(
        kernel,
        out_shape=jax.ShapeDtypeStruct((B, 128), jnp.float32),   # lane-dense
        in_specs=[pl.BlockSpec(memory_space=pltpu.MemorySpace.VMEM)] * len(inputs),
        out_specs=pl.BlockSpec(memory_space=pltpu.MemorySpace.VMEM),
        cost_estimate=pl.CostEstimate(flops=int(flops),
                                      transcendentals=int(trans),
                                      bytes_accessed=int(bytes_accessed)),
    )(*inputs)
    return out[:, :1]  # (B, 1) == output.view(-1, 1)


# ---------------------------------------------------------------------------
# Parameter construction (deterministic, DCGAN-style init)
# ---------------------------------------------------------------------------
def init_netD_params(key, image_size=IMAGE_SIZE, ndf=NDF, nc=NC):
    n = math.log2(image_size)
    assert n == round(n) and n >= 3
    n = int(n)
    params = {}
    key, k0 = jax.random.split(key)
    params["conv_in"] = 0.02 * jax.random.normal(k0, (ndf, nc, 4, 4), jnp.float32)
    pyramid = []
    for i in range(n - 3):
        cin, cout = ndf * 2 ** i, ndf * 2 ** (i + 1)
        key, kw = jax.random.split(key)
        w = 0.02 * jax.random.normal(kw, (cout, cin, 4, 4), jnp.float32)
        gamma = jnp.ones((cout,), jnp.float32)
        beta = jnp.zeros((cout,), jnp.float32)
        pyramid.append((w, gamma, beta))
    params["pyramid"] = pyramid
    key, ko = jax.random.split(key)
    params["conv_out"] = 0.02 * jax.random.normal(
        ko, (1, ndf * 2 ** (n - 3), 4, 4), jnp.float32)
    return params


# ---------------------------------------------------------------------------
# Pure-JAX reference (same math, f32, no Pallas) for a sanity check
# ---------------------------------------------------------------------------
def netD_forward_ref(x_nchw, params):
    def conv(x, w, stride, pad):
        return jax.lax.conv_general_dilated(
            x, w, (stride, stride), [(pad, pad), (pad, pad)],
            dimension_numbers=("NCHW", "OIHW", "NCHW"))

    x = conv(x_nchw, params["conv_in"], 2, 1)
    x = jnp.where(x > 0, x, LEAKY_SLOPE * x)
    for w, gamma, beta in params["pyramid"]:
        x = conv(x, w, 2, 1)
        mean = jnp.mean(x, axis=(0, 2, 3), keepdims=True)
        var = jnp.mean((x - mean) ** 2, axis=(0, 2, 3), keepdims=True)
        x = (x - mean) * jax.lax.rsqrt(var + BN_EPS)
        x = x * gamma.reshape(1, -1, 1, 1) + beta.reshape(1, -1, 1, 1)
        x = jnp.where(x > 0, x, LEAKY_SLOPE * x)
    x = conv(x, params["conv_out"], 1, 0)
    x = jax.nn.sigmoid(x)
    return x.reshape(-1, 1)


if __name__ == "__main__":
    key = jax.random.PRNGKey(0)
    k_in, k_par = jax.random.split(key)
    x = jax.random.normal(k_in, (BATCH, NC, IMAGE_SIZE, IMAGE_SIZE), jnp.float32)
    params = init_netD_params(k_par)

    # One-time weight prep (bf16 dense conv matrices + BN helpers), off hot path.
    weights, meta = prepare_netD(params, batch=BATCH)

    out = netD_forward(x, weights, meta=meta)
    out = jax.block_until_ready(out)
    assert out.shape == (BATCH, 1), out.shape

    ref = jax.block_until_ready(netD_forward_ref(x, params))
    # bf16 weights/activations with f32 accumulation vs. the pure-f32 reference:
    # a slightly relaxed tolerance still catches any algorithmic error.
    assert jnp.allclose(out, ref, rtol=5e-3, atol=5e-3), (out, ref)

    print("KERNEL_OK")
</pallas_src>

<mosaic_0001>
module attributes {stable_mosaic.version = 11 : i64} {
  func.func @_fused_netD_kernel(%arg0: memref<2x256xf32, #tpu.memory_space<vmem>>, %arg1: memref<256x512xbf16, #tpu.memory_space<vmem>>, %arg2: memref<512x256xbf16, #tpu.memory_space<vmem>>, %arg3: memref<256x16xbf16, #tpu.memory_space<vmem>>, %arg4: memref<16x256xf32, #tpu.memory_space<vmem>>, %arg5: memref<1x16xf32, #tpu.memory_space<vmem>>, %arg6: memref<1x16xf32, #tpu.memory_space<vmem>>, %arg7: memref<256x128xbf16, #tpu.memory_space<vmem>>, %arg8: memref<2x128xf32, #tpu.memory_space<vmem>>) attributes {dimension_semantics = [], scalar_prefetch = 0 : i64, scratch_operands = 0 : i64, tpu.core_type = #tpu.core_type<tc>} {
    %c0 = arith.constant 0 : index
    %c0_0 = arith.constant 0 : index
    %0 = vector.load %arg0[%c0, %c0_0] : memref<2x256xf32, #tpu.memory_space<vmem>>, vector<2x256xf32>
    %c0_1 = arith.constant 0 : index
    %c0_2 = arith.constant 0 : index
    %1 = vector.load %arg1[%c0_1, %c0_2] : memref<256x512xbf16, #tpu.memory_space<vmem>>, vector<256x512xbf16>
    %2 = arith.truncf %0 : vector<2x256xf32> to vector<2x256xbf16>
    %cst = arith.constant dense<0.000000e+00> : vector<2x512xf32>
    %3 = tpu.matmul %2, %1, %cst {dimension_numbers = #tpu.dot_dimension_numbers<[1], [0], [0], [1], [0, 0, 1, 1], [], []>} : vector<2x256xbf16>, vector<256x512xbf16>, vector<2x512xf32> -> vector<2x512xf32>
    %cst_3 = arith.constant 2.000000e-01 : f32
    %4 = vector.broadcast %cst_3 : f32 to vector<2x512xf32>
    %5 = arith.mulf %4, %3 : vector<2x512xf32>
    %6 = arith.maximumf %3, %5 : vector<2x512xf32>
    %c0_4 = arith.constant 0 : index
    %c0_5 = arith.constant 0 : index
    %7 = vector.load %arg2[%c0_4, %c0_5] : memref<512x256xbf16, #tpu.memory_space<vmem>>, vector<512x256xbf16>
    %8 = arith.truncf %6 : vector<2x512xf32> to vector<2x512xbf16>
    %cst_6 = arith.constant dense<0.000000e+00> : vector<2x256xf32>
    %9 = tpu.matmul %8, %7, %cst_6 {dimension_numbers = #tpu.dot_dimension_numbers<[1], [0], [0], [1], [0, 0, 1, 1], [], []>} : vector<2x512xbf16>, vector<512x256xbf16>, vector<2x256xf32> -> vector<2x256xf32>
    %c0_7 = arith.constant 0 : index
    %c0_8 = arith.constant 0 : index
    %10 = vector.load %arg3[%c0_7, %c0_8] : memref<256x16xbf16, #tpu.memory_space<vmem>>, vector<256x16xbf16>
    %c0_9 = arith.constant 0 : index
    %c0_10 = arith.constant 0 : index
    %11 = vector.load %arg4[%c0_9, %c0_10] : memref<16x256xf32, #tpu.memory_space<vmem>>, vector<16x256xf32>
    %c0_11 = arith.constant 0 : index
    %c0_12 = arith.constant 0 : index
    %12 = vector.load %arg5[%c0_11, %c0_12] : memref<1x16xf32, #tpu.memory_space<vmem>>, vector<1x16xf32>
    %c0_13 = arith.constant 0 : index
    %c0_14 = arith.constant 0 : index
    %13 = vector.load %arg6[%c0_13, %c0_14] : memref<1x16xf32, #tpu.memory_space<vmem>>, vector<1x16xf32>
    %14 = arith.truncf %9 : vector<2x256xf32> to vector<2x256xbf16>
    %15 = arith.mulf %9, %9 : vector<2x256xf32>
    %16 = arith.truncf %15 : vector<2x256xf32> to vector<2x256xbf16>
    %cst_15 = arith.constant dense<0.000000e+00> : vector<2x16xf32>
    %17 = tpu.matmul %14, %10, %cst_15 {dimension_numbers = #tpu.dot_dimension_numbers<[1], [0], [0], [1], [0, 0, 1, 1], [], []>} : vector<2x256xbf16>, vector<256x16xbf16>, vector<2x16xf32> -> vector<2x16xf32>
    %cst_16 = arith.constant dense<0.000000e+00> : vector<16xf32>
    %18 = vector.multi_reduction <add>, %17, %cst_16 [0] : vector<2x16xf32> to vector<16xf32>
    %19 = vector.shape_cast %18 : vector<16xf32> to vector<1x16xf32>
    %cst_17 = arith.constant dense<0.000000e+00> : vector<2x16xf32>
    %20 = tpu.matmul %16, %10, %cst_17 {dimension_numbers = #tpu.dot_dimension_numbers<[1], [0], [0], [1], [0, 0, 1, 1], [], []>} : vector<2x256xbf16>, vector<256x16xbf16>, vector<2x16xf32> -> vector<2x16xf32>
    %cst_18 = arith.constant dense<0.000000e+00> : vector<16xf32>
    %21 = vector.multi_reduction <add>, %20, %cst_18 [0] : vector<2x16xf32> to vector<16xf32>
    %22 = vector.shape_cast %21 : vector<16xf32> to vector<1x16xf32>
    %23 = arith.mulf %19, %19 : vector<1x16xf32>
    %24 = arith.subf %22, %23 : vector<1x16xf32>
    %cst_19 = arith.constant 9.99999974E-6 : f32
    %25 = vector.broadcast %cst_19 : f32 to vector<1x16xf32>
    %26 = arith.addf %24, %25 : vector<1x16xf32>
    %27 = math.rsqrt %26 : vector<1x16xf32>
    %28 = arith.mulf %12, %27 : vector<1x16xf32>
    %29 = arith.mulf %28, %19 : vector<1x16xf32>
    %30 = arith.subf %13, %29 : vector<1x16xf32>
    %cst_20 = arith.constant dense<0.000000e+00> : vector<1x256xf32>
    %31 = tpu.matmul %28, %11, %cst_20 {dimension_numbers = #tpu.dot_dimension_numbers<[1], [0], [0], [1], [0, 0, 1, 1], [], []>} : vector<1x16xf32>, vector<16x256xf32>, vector<1x256xf32> -> vector<1x256xf32>
    %cst_21 = arith.constant dense<0.000000e+00> : vector<1x256xf32>
    %32 = tpu.matmul %30, %11, %cst_21 {dimension_numbers = #tpu.dot_dimension_numbers<[1], [0], [0], [1], [0, 0, 1, 1], [], []>} : vector<1x16xf32>, vector<16x256xf32>, vector<1x256xf32> -> vector<1x256xf32>
    %33 = vector.broadcast %31 : vector<1x256xf32> to vector<2x256xf32>
    %34 = arith.mulf %9, %33 : vector<2x256xf32>
    %35 = vector.broadcast %32 : vector<1x256xf32> to vector<2x256xf32>
    %36 = arith.addf %34, %35 : vector<2x256xf32>
    %cst_22 = arith.constant 2.000000e-01 : f32
    %37 = vector.broadcast %cst_22 : f32 to vector<2x256xf32>
    %38 = arith.mulf %37, %36 : vector<2x256xf32>
    %39 = arith.maximumf %36, %38 : vector<2x256xf32>
    %c0_23 = arith.constant 0 : index
    %c0_24 = arith.constant 0 : index
    %40 = vector.load %arg7[%c0_23, %c0_24] : memref<256x128xbf16, #tpu.memory_space<vmem>>, vector<256x128xbf16>
    %41 = arith.truncf %39 : vector<2x256xf32> to vector<2x256xbf16>
    %cst_25 = arith.constant dense<0.000000e+00> : vector<2x128xf32>
    %42 = tpu.matmul %41, %40, %cst_25 {dimension_numbers = #tpu.dot_dimension_numbers<[1], [0], [0], [1], [0, 0, 1, 1], [], []>} : vector<2x256xbf16>, vector<256x128xbf16>, vector<2x128xf32> -> vector<2x128xf32>
    %cst_26 = arith.constant 0.000000e+00 : f32
    %43 = vector.broadcast %cst_26 : f32 to vector<2x128xf32>
    %44 = arith.subf %43, %42 : vector<2x128xf32>
    %45 = math.exp %44 : vector<2x128xf32>
    %cst_27 = arith.constant 1.000000e+00 : f32
    %46 = vector.broadcast %cst_27 : f32 to vector<2x128xf32>
    %47 = arith.addf %46, %45 : vector<2x128xf32>
    %cst_28 = arith.constant 1.000000e+00 : f32
    %48 = vector.broadcast %cst_28 : f32 to vector<2x128xf32>
    %49 = arith.divf %48, %47 : vector<2x128xf32>
    %c0_29 = arith.constant 0 : index
    %c0_30 = arith.constant 0 : index
    %50 = vector.load %arg8[%c0_29, %c0_30] : memref<2x128xf32, #tpu.memory_space<vmem>>, vector<2x128xf32>
    tpu.vector_store %arg8[%c0_29, %c0_30], %49 {strides = array<i32>} : memref<2x128xf32, #tpu.memory_space<vmem>>, vector<2x128xf32>,
    return
  }
}

</mosaic_0001>

<bundles_post_ra>
// kernel: netD_forward.1
= control target key start
LH: loop header
LB: loop body
LE: loop exit
PB: predicated region body
PF: predicated region fallthrough
CT: control target
= control target key end

     0   :  { %13 = vsyncpa [#allocation3], 0  ;;  %s2412_s0 = inlined_call_operand.vmem [shape: f32[2,256], index: 0, kind: input, shape index: {}]   ;;  %s2413_s1 = inlined_call_operand.hbm [shape: bf16[256,512], index: 1, kind: input, shape index: {}]   ;;  %s2414_s2 = inlined_call_operand.hbm [shape: bf16[512,256], index: 2, kind: input, shape index: {}]   ;;  %s2415_s3 = inlined_call_operand.vmem [shape: bf16[256,16], index: 3, kind: input, shape index: {}]   ;;  %s2416_s4 = inlined_call_operand.vmem [shape: f32[16,256], index: 4, kind: input, shape index: {}]   ;;  %s2417_s5 = inlined_call_operand.vmem [shape: f32[1,16], index: 5, kind: input, shape index: {}]   ;;  %s2418_s6 = inlined_call_operand.vmem [shape: f32[1,16], index: 6, kind: input, shape index: {}]   ;;  %s2419_s7 = inlined_call_operand.vmem [shape: bf16[256,128], index: 7, kind: input, shape index: {}]   ;;  %s2420_s8 = inlined_call_operand.vmem [shape: f32[2,128], index: 8, kind: output, shape index: {}]  }
   0x1   :  { %14 = vsyncpa [#allocation5], 0  ;;  %s2140_s27 = smov [#allocation2]   ;;  %s2092_s9 = scalar_lea.hbm %s2413_s1, 8192 }
   0x2   :  { %s22_s28 = sshll.u32 %s2140_s27, 4  ;;  %p2093_p0 = scmp.ne.s32.totalorder %s2413_s1, %s2092_s9  ;;  %s23_s28 = int_to_ptr.vmem [resolvable:$true] %s22_s28 }
   0x3   :  { %p2096_p1 = scmp.lt.u32.totalorder %s2092_s9, %s2413_s1 }
   0x5   :  { %p2098_p2 = pnand %p2096_p1, %p2093_p0 }
   0x7   :  { %2101 = shalt.err (!%p2098_p2)
}
   0x8   :  { %s2102_s14 = scalar_lea.vmem %s23_s28, 8192  ;;  %p2107_p4 = scmp.lt.s32.totalorder %s23_s28, %s23_s28 }
   0x9   :  { %p2103_p3 = scmp.ne.s32.totalorder %s23_s28, %s2102_s14  ;;  %p2108_p5 = scmp.lt.s32.totalorder %s2102_s14, %s2102_s14 }
   0xb   :  { %p2109_p6 = por %p2108_p5, %p2107_p4 }
   0xd   :  { %p2110_p7 = pnand %p2109_p6, %p2103_p3 }
   0xf   :  { %2113 = shalt.err (!%p2110_p7)
}
  0x10   :  { %s2141_s15 = smov 256   ;;  %s2142_s16 = smov 16  }
  0x11   :  { %28 = dma.hbm_to_vmem [thread:$0]  %s2413_s1, 8192, %s23_s28, [#allocation3], %s2141_s15, %s2141_s15, %s2142_s16  }
  0x12   :  { %s2143_s19 = smov [#allocation4]   ;;  %s2114_s23 = scalar_lea.hbm %s2414_s2, 8192 }
  0x13   :  { %s34_s20 = sshll.u32 %s2143_s19, 4  ;;  %p2115_p8 = scmp.ne.s32.totalorder %s2414_s2, %s2114_s23  ;;  %s35_s20 = int_to_ptr.vmem [resolvable:$true] %s34_s20 }
  0x14   :  { %p2118_p9 = scmp.lt.u32.totalorder %s2114_s23, %s2414_s2 }
  0x16   :  { %p2120_p10 = pnand %p2118_p9, %p2115_p8 }
  0x18   :  { %2123 = shalt.err (!%p2120_p10)
}
  0x19   :  { %s2124_s29 = scalar_lea.vmem %s35_s20, 8192  ;;  %p2129_p12 = scmp.lt.s32.totalorder %s35_s20, %s35_s20 }
  0x1a   :  { %p2125_p11 = scmp.ne.s32.totalorder %s35_s20, %s2124_s29  ;;  %p2130_p13 = scmp.lt.s32.totalorder %s2124_s29, %s2124_s29 }
  0x1c   :  { %p2131_p0 = por %p2130_p13, %p2129_p12 }
  0x1e   :  { %p2132_p1 = pnand %p2131_p0, %p2125_p11 }
  0x20   :  { %2135 = shalt.err (!%p2132_p1)
}
  0x21   :  { %s2144_s1 = smov 128   ;;  %s2145_s28 = smov 8  }
  0x22   :  { %40 = dma.hbm_to_vmem [thread:$0]  %s2414_s2, 8192, %s35_s20, [#allocation5], %s2144_s1, %s2144_s1, %s2145_s28  }
  0x23   :  { %2136 = dma.done.wait [#allocation3], 8192  }
  0x24   :  { %2137 = vsyncadd [#allocation3], 4294959104 }
  0x25   :  { %2138 = dma.done.wait [#allocation5], 8192  }
  0x26   :  { %2139 = vsyncadd [#allocation5], 4294959104  ;;  %v1862_v0 = vld [vmem:[#allocation2 + $0x4] ss:$16 sps:$4 sm:$0xff]   ;;  %v1864_v1 = vld [vmem:[#allocation2] ss:$16 sps:$4 sm:$0xff]  }
  0x27   :  { %456 = vmatprep.subr.bf16.mxu0 %v1862_v0  ;;  %v1865_v2 = vld [vmem:[#allocation2 + $0x24] ss:$16 sps:$4 sm:$0xff]   ;;  %v1867_v3 = vld [vmem:[#allocation2 + $0x20] ss:$16 sps:$4 sm:$0xff]   ;;  %v1909_v13 = vld [vmem:[#allocation2 + $0xc] ss:$16 sps:$4 sm:$0xff]  }
  0x28   :  { %457 = vmatpush1.bf16.msra.mxu0 %v1864_v1  ;;  %v1868_v4 = vld [vmem:[#allocation2 + $0x44] ss:$16 sps:$4 sm:$0xff]   ;;  %v1870_v5 = vld [vmem:[#allocation2 + $0x40] ss:$16 sps:$4 sm:$0xff]   ;;  %v1912_v15 = vld [vmem:[#allocation2 + $0x8] ss:$16 sps:$4 sm:$0xff]   ;;  %497 = vmatprep.subr.bf16.mxu1 %v1909_v13 }
  0x29   :  { %458 = vmatprep.subr.bf16.mxu0 %v1865_v2  ;;  %v1871_v6 = vld [vmem:[#allocation2 + $0x64] ss:$16 sps:$4 sm:$0xff]   ;;  %v1873_v7 = vld [vmem:[#allocation2 + $0x60] ss:$16 sps:$4 sm:$0xff]   ;;  %498 = vmatpush1.bf16.msra.mxu1 %v1912_v15  ;;  %v1913_v19 = vld [vmem:[#allocation2 + $0x2c] ss:$16 sps:$4 sm:$0xff]  }
  0x2a   :  { %v1874_v8 = vld [vmem:[#allocation2 + $0x84] ss:$16 sps:$4 sm:$0xff]   ;;  %v1876_v9 = vld [vmem:[#allocation2 + $0x80] ss:$16 sps:$4 sm:$0xff]   ;;  %v1915_v20 = vld [vmem:[#allocation2 + $0x28] ss:$16 sps:$4 sm:$0xff]   ;;  %499 = vmatprep.subr.bf16.mxu1 %v1913_v19 }
  0x2b   :  { %v1877_v10 = vld [vmem:[#allocation2 + $0xa4] ss:$16 sps:$4 sm:$0xff]   ;;  %v1879_v11 = vld [vmem:[#allocation2 + $0xa0] ss:$16 sps:$4 sm:$0xff]   ;;  %v1916_v22 = vld [vmem:[#allocation2 + $0x4c] ss:$16 sps:$4 sm:$0xff]  }
  0x2c   :  { %459 = vmatpush1.bf16.msra.mxu0 %v1867_v3  ;;  %v1880_v12 = vld [vmem:[#allocation2 + $0xc4] ss:$16 sps:$4 sm:$0xff]   ;;  %v1882_v14 = vld [vmem:[#allocation2 + $0xc0] ss:$16 sps:$4 sm:$0xff]   ;;  %v1918_v25 = vld [vmem:[#allocation2 + $0x48] ss:$16 sps:$4 sm:$0xff]  }
  0x2d   :  { %460 = vmatprep.subr.bf16.mxu0 %v1868_v4  ;;  %v2219_v16 = vld.sshfl [vmem:[%s2412_s0] sm:$0x33 pattern:$0x76325410]  ;;  %v1883_v17 = vld [vmem:[#allocation2 + $0xe4] ss:$16 sps:$4 sm:$0xff]   ;;  %500 = vmatpush1.bf16.msra.mxu1 %v1915_v20 }
  0x2e   :  { %v131_v18 = vcombine.high %v2219_v16, %v2219_v16  ;;  %v1885_v23 = vld [vmem:[#allocation2 + $0xe0] ss:$16 sps:$4 sm:$0xff]   ;;  %v1886_v24 = vld [vmem:[#allocation2 + $0x104] ss:$16 sps:$4 sm:$0xff]   ;;  %501 = vmatprep.subr.bf16.mxu1 %v1916_v22  ;;  %v1919_v26 = vld [vmem:[#allocation2 + $0x6c] ss:$16 sps:$4 sm:$0xff]   ;;  %v134_v60 = vpack.c.bf16 %v2219_v16, %v2219_v16 }
  0x2f   :  { %v1888_v27 = vld [vmem:[#allocation2 + $0x100] ss:$16 sps:$4 sm:$0xff]   ;;  %v1889_v28 = vld [vmem:[#allocation2 + $0x124] ss:$16 sps:$4 sm:$0xff]   ;;  %v1921_v29 = vld [vmem:[#allocation2 + $0x68] ss:$16 sps:$4 sm:$0xff]  }
  0x30   :  { %461 = vmatpush1.bf16.msra.mxu0 %v1870_v5  ;;  %v135_v21 = vpack.c.bf16 %v131_v18, %v131_v18  ;;  %v1922_v30 = vld [vmem:[#allocation2 + $0x8c] ss:$16 sps:$4 sm:$0xff]   ;;  %v1891_v31 = vld [vmem:[#allocation2 + $0x120] ss:$16 sps:$4 sm:$0xff]   ;;  %v1892_v32 = vld [vmem:[#allocation2 + $0x144] ss:$16 sps:$4 sm:$0xff]  }
  0x31   :  { %462 = vmatprep.subr.bf16.mxu0 %v1871_v6  ;;  %502 = vmatpush1.bf16.msra.mxu1 %v1918_v25  ;;  %v1924_v33 = vld [vmem:[#allocation2 + $0x88] ss:$16 sps:$4 sm:$0xff]   ;;  %v1925_v34 = vld [vmem:[#allocation2 + $0xac] ss:$16 sps:$4 sm:$0xff]   ;;  %v1894_v35 = vld [vmem:[#allocation2 + $0x140] ss:$16 sps:$4 sm:$0xff]  }
  0x32   :  { %488 = vmatprep.mubr.bf16.mxu0 %v135_v21  ;;  %529 = vmatprep.mubr.bf16.mxu1 %v135_v21  ;;  %v1895_v36 = vld [vmem:[#allocation2 + $0x164] ss:$16 sps:$4 sm:$0xff]   ;;  %v1927_v37 = vld [vmem:[#allocation2 + $0xa8] ss:$16 sps:$4 sm:$0xff]   ;;  %v1928_v38 = vld [vmem:[#allocation2 + $0xcc] ss:$16 sps:$4 sm:$0xff]  }
  0x33   :  { %503 = vmatprep.subr.bf16.mxu1 %v1919_v26  ;;  %v1897_v39 = vld [vmem:[#allocation2 + $0x160] ss:$16 sps:$4 sm:$0xff]   ;;  %v1898_v40 = vld [vmem:[#allocation2 + $0x184] ss:$16 sps:$4 sm:$0xff]   ;;  %v1930_v41 = vld [vmem:[#allocation2 + $0xc8] ss:$16 sps:$4 sm:$0xff]  }
  0x34   :  { %463 = vmatpush1.bf16.msra.mxu0 %v1873_v7  ;;  %v1931_v42 = vld [vmem:[#allocation2 + $0xec] ss:$16 sps:$4 sm:$0xff]   ;;  %v1900_v43 = vld [vmem:[#allocation2 + $0x180] ss:$16 sps:$4 sm:$0xff]   ;;  %v1901_v44 = vld [vmem:[#allocation2 + $0x1a4] ss:$16 sps:$4 sm:$0xff]  }
  0x35   :  { %464 = vmatprep.subr.bf16.mxu0 %v1874_v8  ;;  %504 = vmatpush1.bf16.msra.mxu1 %v1921_v29  ;;  %v1933_v45 = vld [vmem:[#allocation2 + $0xe8] ss:$16 sps:$4 sm:$0xff]   ;;  %v1934_v46 = vld [vmem:[#allocation2 + $0x10c] ss:$16 sps:$4 sm:$0xff]   ;;  %v1903_v47 = vld [vmem:[#allocation2 + $0x1a0] ss:$16 sps:$4 sm:$0xff]  }
  0x36   :  { %505 = vmatprep.subr.bf16.mxu1 %v1922_v30  ;;  %v1904_v48 = vld [vmem:[#allocation2 + $0x1c4] ss:$16 sps:$4 sm:$0xff]   ;;  %v1936_v49 = vld [vmem:[#allocation2 + $0x108] ss:$16 sps:$4 sm:$0xff]   ;;  %v1937_v50 = vld [vmem:[#allocation2 + $0x12c] ss:$16 sps:$4 sm:$0xff]  }
  0x37   :  { %v1906_v51 = vld [vmem:[#allocation2 + $0x1c0] ss:$16 sps:$4 sm:$0xff]   ;;  %v1907_v52 = vld [vmem:[#allocation2 + $0x1e4] ss:$16 sps:$4 sm:$0xff]   ;;  %v1939_v53 = vld [vmem:[#allocation2 + $0x128] ss:$16 sps:$4 sm:$0xff]  }
  0x38   :  { %465 = vmatpush1.bf16.msra.mxu0 %v1876_v9  ;;  %v1911_v54 = vld [vmem:[#allocation2 + $0x1e0] ss:$16 sps:$4 sm:$0xff]   ;;  %v1940_v55 = vld [vmem:[#allocation2 + $0x14c] ss:$16 sps:$4 sm:$0xff]   ;;  %v1942_v56 = vld [vmem:[#allocation2 + $0x148] ss:$16 sps:$4 sm:$0xff]  }
  0x39   :  { %466 = vmatprep.subr.bf16.mxu0 %v1877_v10  ;;  %506 = vmatpush1.bf16.msra.mxu1 %v1924_v33  ;;  %v1960_v57 = vld [vmem:[#allocation4 + $0x4] ss:$8 sps:$4 sm:$0xff]   ;;  %v1958_v59 = vld [vmem:[#allocation4] ss:$8 sps:$4 sm:$0xff]   ;;  %v1963_v61 = vld [vmem:[#allocation4 + $0x14] ss:$8 sps:$4 sm:$0xff]  }
  0x3a   :  { %507 = vmatprep.subr.bf16.mxu1 %v1925_v34  ;;  %v1943_v58 = vld [vmem:[#allocation2 + $0x16c] ss:$16 sps:$4 sm:$0xff]   ;;  %v1945_v62 = vld [vmem:[#allocation2 + $0x168] ss:$16 sps:$4 sm:$0xff]   ;;  %vm1196_vm0 = vcmask 123904   ;;  %vm1258_vm1 = vcmask 130048  }
  0x3b   :  { %v1946_v63 = vld [vmem:[#allocation2 + $0x18c] ss:$16 sps:$4 sm:$0xff]   ;;  %v1961_v0 = vld [vmem:[#allocation4 + $0x10] ss:$8 sps:$4 sm:$0xff]   ;;  %v1964_v4 = vld [vmem:[#allocation4 + $0x20] ss:$8 sps:$4 sm:$0xff]  }
  0x3c   :  { %467 = vmatpush1.bf16.msra.mxu0 %v1879_v11  ;;  %v1966_v1 = vld [vmem:[#allocation4 + $0x24] ss:$8 sps:$4 sm:$0xff]   ;;  %v1948_v2 = vld [vmem:[#allocation2 + $0x188] ss:$16 sps:$4 sm:$0xff]   ;;  %v1969_v5 = vld [vmem:[#allocation4 + $0x34] ss:$8 sps:$4 sm:$0xff]  }
  0x3d   :  { %468 = vmatprep.subr.bf16.mxu0 %v1880_v12  ;;  %508 = vmatpush1.bf16.msra.mxu1 %v1927_v37  ;;  %v1949_v3 = vld [vmem:[#allocation2 + $0x1ac] ss:$16 sps:$4 sm:$0xff]   ;;  %v1951_v6 = vld [vmem:[#allocation2 + $0x1a8] ss:$16 sps:$4 sm:$0xff]   ;;  %v2228_v37 = vld [vmem:[%s2415_s3 + $0x40] sm:$0xff]  }
  0x3e   :  { %509 = vmatprep.subr.bf16.mxu1 %v1928_v38  ;;  %v1952_v7 = vld [vmem:[#allocation2 + $0x1cc] ss:$16 sps:$4 sm:$0xff]   ;;  %v1967_v8 = vld [vmem:[#allocation4 + $0x30] ss:$8 sps:$4 sm:$0xff]   ;;  %v1970_v12 = vld [vmem:[#allocation4 + $0x40] ss:$8 sps:$4 sm:$0xff]  }
  0x3f   :  { %v1972_v9 = vld [vmem:[#allocation4 + $0x44] ss:$8 sps:$4 sm:$0xff]   ;;  %v1954_v10 = vld [vmem:[#allocation2 + $0x1c8] ss:$16 sps:$4 sm:$0xff]   ;;  %v1975_v13 = vld [vmem:[#allocation4 + $0x54] ss:$8 sps:$4 sm:$0xff]  }
  0x40   :  { %469 = vmatpush1.bf16.msra.mxu0 %v1882_v14  ;;  %v1955_v11 = vld [vmem:[#allocation2 + $0x1ec] ss:$16 sps:$4 sm:$0xff]   ;;  %v1957_v14 = vld [vmem:[#allocation2 + $0x1e8] ss:$16 sps:$4 sm:$0xff]   ;;  %v2233_v38 = vld [vmem:[%s2415_s3] sm:$0xff]  }
  0x41   :  { %470 = vmatprep.subr.bf16.mxu0 %v1883_v17  ;;  %510 = vmatpush1.bf16.msra.mxu1 %v1930_v41  ;;  %v1973_v15 = vld [vmem:[#allocation4 + $0x50] ss:$8 sps:$4 sm:$0xff]   ;;  %v1978_v16 = vld [vmem:[#allocation4 + $0x64] ss:$8 sps:$4 sm:$0xff]   ;;  %v1976_v17 = vld [vmem:[#allocation4 + $0x60] ss:$8 sps:$4 sm:$0xff]  }
  0x42   :  { %511 = vmatprep.subr.bf16.mxu1 %v1931_v42  ;;  %v1981_v18 = vld [vmem:[#allocation4 + $0x74] ss:$8 sps:$4 sm:$0xff]   ;;  %v1979_v19 = vld [vmem:[#allocation4 + $0x70] ss:$8 sps:$4 sm:$0xff]   ;;  %v1984_v20 = vld [vmem:[#allocation4 + $0x84] ss:$8 sps:$4 sm:$0xff]  }
  0x43   :  { %v1982_v21 = vld [vmem:[#allocation4 + $0x80] ss:$8 sps:$4 sm:$0xff]   ;;  %v1987_v22 = vld [vmem:[#allocation4 + $0x94] ss:$8 sps:$4 sm:$0xff]  }
  0x44   :  { %471 = vmatpush1.bf16.msra.mxu0 %v1885_v23  ;;  %v1985_v23 = vld [vmem:[#allocation4 + $0x90] ss:$8 sps:$4 sm:$0xff]   ;;  %v1988_v25 = vld [vmem:[#allocation4 + $0xa0] ss:$8 sps:$4 sm:$0xff]   ;;  %v1993_v26 = vld [vmem:[#allocation4 + $0xb4] ss:$8 sps:$4 sm:$0xff]  }
  0x45   :  { %472 = vmatprep.subr.bf16.mxu0 %v1886_v24  ;;  %512 = vmatpush1.bf16.msra.mxu1 %v1933_v45  ;;  %v1990_v24 = vld [vmem:[#allocation4 + $0xa4] ss:$8 sps:$4 sm:$0xff]   ;;  %v1994_v29 = vld [vmem:[#allocation4 + $0xc0] ss:$8 sps:$4 sm:$0xff]   ;;  %v1999_v30 = vld [vmem:[#allocation4 + $0xd4] ss:$8 sps:$4 sm:$0xff]  }
  0x46   :  { %513 = vmatprep.subr.bf16.mxu1 %v1934_v46  ;;  %v2000_v33 = vld [vmem:[#allocation4 + $0xe0] ss:$8 sps:$4 sm:$0xff]   ;;  %v2005_v34 = vld [vmem:[#allocation4 + $0xf4] ss:$8 sps:$4 sm:$0xff]  }
  0x47   :  { %v2251_v41 = vld [vmem:[%s2415_s3 + $0x50] sm:$0xff]   ;;  %v2275_v45 = vld [vmem:[%s2415_s3 + $0x60] sm:$0xff]  }
  0x48   :  { %473 = vmatpush1.bf16.msra.mxu0 %v1888_v27  ;;  %v1991_v27 = vld [vmem:[#allocation4 + $0xb0] ss:$8 sps:$4 sm:$0xff]   ;;  %v2281_v46 = vld [vmem:[%s2415_s3 + $0x20] sm:$0xff]  }
  0x49   :  { %474 = vmatprep.subr.bf16.mxu0 %v1889_v28  ;;  %514 = vmatpush1.bf16.msra.mxu1 %v1936_v49  ;;  %v1996_v28 = vld [vmem:[#allocation4 + $0xc4] ss:$8 sps:$4 sm:$0xff]   ;;  %v2257_v42 = vld [vmem:[%s2415_s3 + $0x10] sm:$0xff]  }
  0x4a   :  { %515 = vmatprep.subr.bf16.mxu1 %v1937_v50  ;;  %v2299_v49 = vld [vmem:[%s2415_s3 + $0x70] sm:$0xff]  }
  0x4b   :  { %v2305_v50 = vld [vmem:[%s2415_s3 + $0x30] sm:$0xff]  }
  0x4c   :  { %475 = vmatpush1.bf16.msra.mxu0 %v1891_v31  ;;  %v1997_v31 = vld [vmem:[#allocation4 + $0xd0] ss:$8 sps:$4 sm:$0xff]  }
  0x4d   :  { %476 = vmatprep.subr.bf16.mxu0 %v1892_v32  ;;  %516 = vmatpush1.bf16.msra.mxu1 %v1939_v53  ;;  %v2002_v32 = vld [vmem:[#allocation4 + $0xe4] ss:$8 sps:$4 sm:$0xff]  }
  0x4e   :  { %517 = vmatprep.subr.bf16.mxu1 %v1940_v55 }
  0x50   :  { %477 = vmatpush1.bf16.msra.mxu0 %v1894_v35  ;;  %v2003_v35 = vld [vmem:[#allocation4 + $0xf0] ss:$8 sps:$4 sm:$0xff]  }
  0x51   :  { %478 = vmatprep.subr.bf16.mxu0 %v1895_v36  ;;  %518 = vmatpush1.bf16.msra.mxu1 %v1942_v56  ;;  %v2008_v36 = vld [vmem:[#allocation4 + $0x104] ss:$8 sps:$4 sm:$0xff]  }
  0x52   :  { %519 = vmatprep.subr.bf16.mxu1 %v1943_v58 }
  0x54   :  { %479 = vmatpush1.bf16.msra.mxu0 %v1897_v39  ;;  %v2238_v39 = vld [vmem:[%s2415_s3 + $0x48] sm:$0xff]  }
  0x55   :  { %480 = vmatprep.subr.bf16.mxu0 %v1898_v40  ;;  %520 = vmatpush1.bf16.msra.mxu1 %v1945_v62  ;;  %v2245_v40 = vld [vmem:[%s2415_s3 + $0x8] sm:$0xff]   ;;  %v2011_v62 = vld [vmem:[#allocation4 + $0x114] ss:$8 sps:$4 sm:$0xff]  }
  0x56   :  { %521 = vmatprep.subr.bf16.mxu1 %v1946_v63  ;;  %v2009_v63 = vld [vmem:[#allocation4 + $0x110] ss:$8 sps:$4 sm:$0xff]  }
  0x58   :  { %481 = vmatpush1.bf16.msra.mxu0 %v1900_v43  ;;  %v2263_v43 = vld [vmem:[%s2415_s3 + $0x58] sm:$0xff]  }
  0x59   :  { %482 = vmatprep.subr.bf16.mxu0 %v1901_v44  ;;  %522 = vmatpush1.bf16.msra.mxu1 %v1948_v2  ;;  %v2269_v44 = vld [vmem:[%s2415_s3 + $0x18] sm:$0xff]  }
  0x5a   :  { %523 = vmatprep.subr.bf16.mxu1 %v1949_v3  ;;  %v2017_v2 = vld [vmem:[#allocation4 + $0x134] ss:$8 sps:$4 sm:$0xff]   ;;  %v2015_v3 = vld [vmem:[#allocation4 + $0x130] ss:$8 sps:$4 sm:$0xff]  }
  0x5c   :  { %483 = vmatpush1.bf16.msra.mxu0 %v1903_v47  ;;  %v2287_v47 = vld [vmem:[%s2415_s3 + $0x68] sm:$0xff]  }
  0x5d   :  { %484 = vmatprep.subr.bf16.mxu0 %v1904_v48  ;;  %524 = vmatpush1.bf16.msra.mxu1 %v1951_v6  ;;  %v2293_v48 = vld [vmem:[%s2415_s3 + $0x28] sm:$0xff]  }
  0x5e   :  { %525 = vmatprep.subr.bf16.mxu1 %v1952_v7  ;;  %v2023_v7 = vld [vmem:[#allocation4 + $0x154] ss:$8 sps:$4 sm:$0xff]  }
  0x60   :  { %485 = vmatpush1.bf16.msra.mxu0 %v1906_v51 }
  0x61   :  { %486 = vmatprep.subr.bf16.mxu0 %v1907_v52  ;;  %526 = vmatpush1.bf16.msra.mxu1 %v1954_v10 }
  0x62   :  { %527 = vmatprep.subr.bf16.mxu1 %v1955_v11 }
  0x64   :  { %487 = vmatpush1.bf16.msra.mxu0 %v1911_v54 }
  0x65   :  { %934 = vmatprep.subr.bf16.mxu0 %v1960_v57  ;;  %528 = vmatpush1.bf16.msra.mxu1 %v1957_v14  ;;  %v2026_v14 = vld [vmem:[#allocation4 + $0x164] ss:$8 sps:$4 sm:$0xff]  }
  0x66   :  { %1777 = vmatprep.subr.bf16.mxu1 %v2228_v37 }
  0x67   :  { %489 = vmatmul.mubr.bf16.vlgmr.msra.gmra.mrb[0].mxu0 %v134_v60 }
  0x68   :  { %935 = vmatpush1.bf16.msra.mxu0 %v1958_v59  ;;  %530 = vmatmul.mubr.bf16.vlgmr.msra.gmra.mrb[0].mxu1 %v134_v60  ;;  %v2006_v60 = vld [vmem:[#allocation4 + $0x100] ss:$8 sps:$4 sm:$0xff]  }
  0x69   :  { %936 = vmatprep.subr.bf16.mxu0 %v1963_v61  ;;  %1778 = vmatpush3.bf16.msra.mxu1 %v2233_v38 }
  0x6a   :  { %1779 = vmatprep.subr.bf16.mxu1 %v2238_v39 }
  0x6c   :  { %937 = vmatpush1.bf16.msra.mxu0 %v1961_v0  ;;  %v2014_v0 = vld [vmem:[#allocation4 + $0x124] ss:$8 sps:$4 sm:$0xff]  }
  0x6d   :  { %938 = vmatprep.subr.bf16.mxu0 %v1966_v1  ;;  %1780 = vmatpush3.bf16.msra.mxu1 %v2245_v40  ;;  %v2012_v1 = vld [vmem:[#allocation4 + $0x120] ss:$8 sps:$4 sm:$0xff]  }
  0x6e   :  { %1781 = vmatprep.subr.bf16.mxu1 %v2251_v41 }
  0x70   :  { %939 = vmatpush1.bf16.msra.mxu0 %v1964_v4  ;;  %v2020_v4 = vld [vmem:[#allocation4 + $0x144] ss:$8 sps:$4 sm:$0xff]  }
  0x71   :  { %940 = vmatprep.subr.bf16.mxu0 %v1969_v5  ;;  %1782 = vmatpush3.bf16.msra.mxu1 %v2257_v42  ;;  %v2018_v5 = vld [vmem:[#allocation4 + $0x140] ss:$8 sps:$4 sm:$0xff]  }
  0x72   :  { %1783 = vmatprep.subr.bf16.mxu1 %v2263_v43 }
  0x74   :  { %941 = vmatpush1.bf16.msra.mxu0 %v1967_v8 }
  0x75   :  { %942 = vmatprep.subr.bf16.mxu0 %v1972_v9  ;;  %1784 = vmatpush3.bf16.msra.mxu1 %v2269_v44 }
  0x76   :  { %1785 = vmatprep.subr.bf16.mxu1 %v2275_v45 }
  0x78   :  { %943 = vmatpush1.bf16.msra.mxu0 %v1970_v12  ;;  %v2021_v12 = vld [vmem:[#allocation4 + $0x150] ss:$8 sps:$4 sm:$0xff]  }
  0x79   :  { %944 = vmatprep.subr.bf16.mxu0 %v1975_v13  ;;  %1786 = vmatpush3.bf16.msra.mxu1 %v2281_v46 }
  0x7a   :  { %1787 = vmatprep.subr.bf16.mxu1 %v2287_v47 }
  0x7c   :  { %945 = vmatpush1.bf16.msra.mxu0 %v1973_v15 }
  0x7d   :  { %946 = vmatprep.subr.bf16.mxu0 %v1978_v16  ;;  %1788 = vmatpush3.bf16.msra.mxu1 %v2293_v48  ;;  %v2024_v16 = vld [vmem:[#allocation4 + $0x160] ss:$8 sps:$4 sm:$0xff]  }
  0x7e   :  { %1789 = vmatprep.subr.bf16.mxu1 %v2299_v49 }
  0x80   :  { %947 = vmatpush1.bf16.msra.mxu0 %v1976_v17  ;;  %v2029_v17 = vld [vmem:[#allocation4 + $0x174] ss:$8 sps:$4 sm:$0xff]  }
  0x81   :  { %948 = vmatprep.subr.bf16.mxu0 %v1981_v18  ;;  %1790 = vmatpush3.bf16.msra.mxu1 %v2305_v50  ;;  %v2027_v18 = vld [vmem:[#allocation4 + $0x170] ss:$8 sps:$4 sm:$0xff]  }
  0x84   :  { %949 = vmatpush1.bf16.msra.mxu0 %v1979_v19  ;;  %v2032_v19 = vld [vmem:[#allocation4 + $0x184] ss:$8 sps:$4 sm:$0xff]  }
  0x85   :  { %950 = vmatprep.subr.bf16.mxu0 %v1984_v20  ;;  %v2030_v20 = vld [vmem:[#allocation4 + $0x180] ss:$8 sps:$4 sm:$0xff]  }
  0x88   :  { %951 = vmatpush1.bf16.msra.mxu0 %v1982_v21  ;;  %v2035_v21 = vld [vmem:[#allocation4 + $0x194] ss:$8 sps:$4 sm:$0xff]  }
  0x89   :  { %952 = vmatprep.subr.bf16.mxu0 %v1987_v22  ;;  %v2033_v22 = vld [vmem:[#allocation4 + $0x190] ss:$8 sps:$4 sm:$0xff]  }
  0x8c   :  { %953 = vmatpush1.bf16.msra.mxu0 %v1985_v23  ;;  %v2038_v23 = vld [vmem:[#allocation4 + $0x1a4] ss:$8 sps:$4 sm:$0xff]  }
  0x8d   :  { %954 = vmatprep.subr.bf16.mxu0 %v1990_v24  ;;  %v2036_v24 = vld [vmem:[#allocation4 + $0x1a0] ss:$8 sps:$4 sm:$0xff]  }
  0x90   :  { %955 = vmatpush1.bf16.msra.mxu0 %v1988_v25  ;;  %v2041_v25 = vld [vmem:[#allocation4 + $0x1b4] ss:$8 sps:$4 sm:$0xff]  }
  0x91   :  { %956 = vmatprep.subr.bf16.mxu0 %v1993_v26  ;;  %v2039_v26 = vld [vmem:[#allocation4 + $0x1b0] ss:$8 sps:$4 sm:$0xff]  }
  0x94   :  { %957 = vmatpush1.bf16.msra.mxu0 %v1991_v27  ;;  %v2044_v27 = vld [vmem:[#allocation4 + $0x1c4] ss:$8 sps:$4 sm:$0xff]  }
  0x95   :  { %958 = vmatprep.subr.bf16.mxu0 %v1996_v28  ;;  %v2042_v28 = vld [vmem:[#allocation4 + $0x1c0] ss:$8 sps:$4 sm:$0xff]  }
  0x98   :  { %959 = vmatpush1.bf16.msra.mxu0 %v1994_v29  ;;  %v2047_v29 = vld [vmem:[#allocation4 + $0x1d4] ss:$8 sps:$4 sm:$0xff]  }
  0x99   :  { %960 = vmatprep.subr.bf16.mxu0 %v1999_v30  ;;  %v2045_v30 = vld [vmem:[#allocation4 + $0x1d0] ss:$8 sps:$4 sm:$0xff]  }
  0x9c   :  { %961 = vmatpush1.bf16.msra.mxu0 %v1997_v31  ;;  %v2050_v31 = vld [vmem:[#allocation4 + $0x1e4] ss:$8 sps:$4 sm:$0xff]  }
  0x9d   :  { %962 = vmatprep.subr.bf16.mxu0 %v2002_v32  ;;  %v2048_v32 = vld [vmem:[#allocation4 + $0x1e0] ss:$8 sps:$4 sm:$0xff]  }
  0xa0   :  { %963 = vmatpush1.bf16.msra.mxu0 %v2000_v33 }
  0xa1   :  { %964 = vmatprep.subr.bf16.mxu0 %v2005_v34  ;;  %v2053_v34 = vld [vmem:[#allocation4 + $0x1f4] ss:$8 sps:$4 sm:$0xff]  }
  0xa4   :  { %965 = vmatpush1.bf16.msra.mxu0 %v2003_v35  ;;  %v2051_v35 = vld [vmem:[#allocation4 + $0x1f0] ss:$8 sps:$4 sm:$0xff]  }
  0xa5   :  { %975 = vmatprep.subr.bf16.mxu0 %v2008_v36 }
 0x13a   :  { %v490_v51 = vpop.f32.mrb[0].mxu0 }
 0x13b   :  { %v538_v52 = vmul.f32 0.2, %v490_v51  ;;  %v492_v53 = vpop.f32.mrb[1].mxu0  ;;  %v531_v6 = vpop.f32.mrb[0].mxu1 }
 0x13c   :  { %v539_v54 = vmul.f32 0.2, %v492_v53  ;;  %v494_v55 = vpop.f32.mrb[2].mxu0  ;;  %v533_v8 = vpop.f32.mrb[1].mxu1  ;;  %v540_v33 = vmul.f32 0.2, %v531_v6 }
 0x13d   :  { %v542_v56 = vmax.f32 %v490_v51, %v538_v52  ;;  %v495_v57 = vpop.f32.mrb[3].mxu0  ;;  %v541_v9 = vmul.f32 0.2, %v533_v8  ;;  %v535_v10 = vpop.f32.mrb[2].mxu1  ;;  %v2068_v52 = vld [vmem:[%s2415_s3 + $0x78] sm:$0xff]  }
 0x13e   :  { %v543_v58 = vmax.f32 %v492_v53, %v539_v54  ;;  %v536_v11 = vpop.f32.mrb[3].mxu1  ;;  %v544_v36 = vmax.f32 %v531_v6, %v540_v33  ;;  %v2069_v53 = vld [vmem:[%s2415_s3 + $0x38] sm:$0xff]   ;;  %1791 = vmatprep.subr.bf16.mxu1 %v2068_v52 }
 0x13f   :  { %v610_v61 = vpack.c.bf16 %v542_v56, %v542_v56  ;;  %v545_v13 = vmax.f32 %v533_v8, %v541_v9  ;;  %1792 = vmatpush3.bf16.msra.mxu1 %v2069_v53  ;;  %v2077_v33 = vld [vmem:[%s2419_s7 + $0x18] sm:$0xff]  }
 0x140   :  { %v611_v59 = vpack.c.bf16 %v543_v58, %v543_v58  ;;  %v612_v51 = vpack.c.bf16 %v544_v36, %v544_v36  ;;  %1799 = vmatprep.subr.bf16.mxu1 %v2228_v37  ;;  %v2080_v36 = vld [vmem:[%s2419_s7 + $0x68] sm:$0xff]  }
 0x141   :  { %v613_v15 = vpack.c.bf16 %v545_v13, %v545_v13 }
 0x142   :  { %966 = vmatprep.mubr.bf16.mxu0 %v611_v59 }
 0x143   :  { %967 = vmatmul.mubr.bf16.vlgmr.msra.gmra.mrb[4].mxu0 %v610_v61 }
 0x144   :  { %976 = vmatpush1.bf16.msra.mxu0 %v2006_v60  ;;  %1007 = vmatprep.mubr.bf16.mxu0 %v613_v15 }
 0x145   :  { %977 = vmatprep.subr.bf16.mxu0 %v2011_v62 }
 0x148   :  { %978 = vmatpush1.bf16.msra.mxu0 %v2009_v63 }
 0x149   :  { %979 = vmatprep.subr.bf16.mxu0 %v2014_v0 }
 0x14c   :  { %980 = vmatpush1.bf16.msra.mxu0 %v2012_v1 }
 0x14d   :  { %981 = vmatprep.subr.bf16.mxu0 %v2017_v2 }
 0x150   :  { %982 = vmatpush1.bf16.msra.mxu0 %v2015_v3 }
 0x151   :  { %983 = vmatprep.subr.bf16.mxu0 %v2020_v4 }
 0x154   :  { %984 = vmatpush1.bf16.msra.mxu0 %v2018_v5 }
 0x155   :  { %985 = vmatprep.subr.bf16.mxu0 %v2023_v7 }
 0x158   :  { %986 = vmatpush1.bf16.msra.mxu0 %v2021_v12 }
 0x159   :  { %987 = vmatprep.subr.bf16.mxu0 %v2026_v14 }
 0x15c   :  { %988 = vmatpush1.bf16.msra.mxu0 %v2024_v16 }
 0x15d   :  { %989 = vmatprep.subr.bf16.mxu0 %v2029_v17 }
 0x160   :  { %990 = vmatpush1.bf16.msra.mxu0 %v2027_v18 }
 0x161   :  { %991 = vmatprep.subr.bf16.mxu0 %v2032_v19 }
 0x164   :  { %992 = vmatpush1.bf16.msra.mxu0 %v2030_v20  ;;  %v1052_v20 = vld [vmem:[%s2417_s5] sm:$0x1] }
 0x165   :  { %993 = vmatprep.subr.bf16.mxu0 %v2035_v21 }
 0x168   :  { %994 = vmatpush1.bf16.msra.mxu0 %v2033_v22 }
 0x169   :  { %995 = vmatprep.subr.bf16.mxu0 %v2038_v23  ;;  %v2070_v23 = vld [vmem:[%s2419_s7 + $0x40] sm:$0xff]  }
 0x16c   :  { %996 = vmatpush1.bf16.msra.mxu0 %v2036_v24  ;;  %v1053_v24 = vld [vmem:[%s2418_s6] sm:$0x1] }
 0x16d   :  { %997 = vmatprep.subr.bf16.mxu0 %v2041_v25 }
 0x170   :  { %998 = vmatpush1.bf16.msra.mxu0 %v2039_v26  ;;  %v2071_v26 = vld [vmem:[%s2419_s7] sm:$0xff]  }
 0x171   :  { %999 = vmatprep.subr.bf16.mxu0 %v2044_v27 }
 0x174   :  { %1000 = vmatpush1.bf16.msra.mxu0 %v2042_v28  ;;  %v2072_v28 = vld [vmem:[%s2419_s7 + $0x48] sm:$0xff]  }
 0x175   :  { %1001 = vmatprep.subr.bf16.mxu0 %v2047_v29  ;;  %v2073_v29 = vld [vmem:[%s2419_s7 + $0x8] sm:$0xff]  }
 0x178   :  { %1002 = vmatpush1.bf16.msra.mxu0 %v2045_v30  ;;  %v2074_v30 = vld [vmem:[%s2419_s7 + $0x50] sm:$0xff]  }
 0x179   :  { %1003 = vmatprep.subr.bf16.mxu0 %v2050_v31  ;;  %v2075_v31 = vld [vmem:[%s2419_s7 + $0x10] sm:$0xff]  }
 0x17c   :  { %1004 = vmatpush1.bf16.msra.mxu0 %v2048_v32  ;;  %v2076_v32 = vld [vmem:[%s2419_s7 + $0x58] sm:$0xff]  }
 0x17d   :  { %1005 = vmatprep.subr.bf16.mxu0 %v2053_v34  ;;  %v2078_v34 = vld [vmem:[%s2419_s7 + $0x60] sm:$0xff]  }
 0x180   :  { %1006 = vmatpush1.bf16.msra.mxu0 %v2051_v35  ;;  %v2079_v35 = vld [vmem:[%s2419_s7 + $0x20] sm:$0xff]  }
 0x183   :  { %1008 = vmatmul.mubr.bf16.vlgmr.msra.gmra.mrb[4].mxu0 %v612_v51  ;;  %v2081_v51 = vld [vmem:[%s2419_s7 + $0x28] sm:$0xff]  }
 0x256   :  { %v2316_v54 = vpop.f32.mrb[4].mxu0 }
 0x257   :  { %v2318_v55 = vpop.f32.mrb[5].mxu0  ;;  %v1054_v59 = vpack.c.bf16 %v2316_v54, %v2316_v54  ;;  %v1056_v37 = vmul.f32 %v2316_v54, %v2316_v54 }
 0x258   :  { %v1055_v56 = vpack.c.bf16 %v2318_v55, %v2318_v55  ;;  %v1057_v57 = vmul.f32 %v2318_v55, %v2318_v55  ;;  %v1013_v58 = vpop.f32.mrb[6].mxu0 }
 0x259   :  { %v1014_v60 = vpop.f32.mrb[7].mxu0  ;;  %v1407_v58 = vlaneseq }
 0x25a   :  { %1188 = vmatprep.mubr.bf16.mxu1 %v1055_v56  ;;  %v1059_v61 = vpack.c.bf16 %v1057_v57, %v1057_v57  ;;  %v2084_v56 = vld [vmem:[%s2419_s7 + $0x78] sm:$0xff]  }
 0x25b   :  { %1189 = vmatmul.mubr.bf16.vlgmr.msra.gmra.mrb[4].mxu1 %v1054_v59  ;;  %v2085_v57 = vld [vmem:[%s2419_s7 + $0x38] sm:$0xff]   ;;  %v1408_v59 = vshrl.u32 %v1407_v58, 7 }
 0x25c   :  { %1800 = vmatpush3.bf16.msra.mxu1 %v2233_v38  ;;  %1236 = vmatprep.mubr.bf16.mxu1 %v1059_v61  ;;  %v1058_v38 = vpack.c.bf16 %v1056_v37, %v1056_v37 }
 0x25d   :  { %1801 = vmatprep.subr.bf16.mxu1 %v2238_v39  ;;  %v1049_v39 = vld [vmem:[%s2416_s4 + $0x8] sm:$0xff]  ;;  %v1409_v60 = vsub.s32 0, %v1408_v59 }
 0x260   :  { %1802 = vmatpush3.bf16.msra.mxu1 %v2245_v40  ;;  %v1051_v40 = vld [vmem:[%s2416_s4 + $0x18] sm:$0xff] }
 0x261   :  { %1803 = vmatprep.subr.bf16.mxu1 %v2251_v41  ;;  %v1048_v41 = vld [vmem:[%s2416_s4] sm:$0xff] }
 0x264   :  { %1804 = vmatpush3.bf16.msra.mxu1 %v2257_v42  ;;  %v1843_v42 = vpack.c.bf16 %v1051_v40, %v1049_v39 }
 0x265   :  { %1805 = vmatprep.subr.bf16.mxu1 %v2263_v43  ;;  %v1050_v43 = vld [vmem:[%s2416_s4 + $0x10] sm:$0xff] }
 0x268   :  { %1806 = vmatpush3.bf16.msra.mxu1 %v2269_v44  ;;  %v2146_v44 = vmov 0.0  }
 0x269   :  { %1807 = vmatprep.subr.bf16.mxu1 %v2275_v45  ;;  %v1845_v45 = vpack.c.bf16 %v1050_v43, %v1048_v41 }
 0x26c   :  { %1808 = vmatpush3.bf16.msra.mxu1 %v2281_v46 }
 0x26d   :  { %1809 = vmatprep.subr.bf16.mxu1 %v2287_v47 }
 0x270   :  { %1810 = vmatpush3.bf16.msra.mxu1 %v2293_v48 }
 0x271   :  { %1811 = vmatprep.subr.bf16.mxu1 %v2299_v49 }
 0x274   :  { %1812 = vmatpush3.bf16.msra.mxu1 %v2305_v50 }
 0x275   :  { %1813 = vmatprep.subr.bf16.mxu1 %v2068_v52  ;;  %v2082_v52 = vld [vmem:[%s2419_s7 + $0x70] sm:$0xff]  }
 0x278   :  { %1814 = vmatpush3.bf16.msra.mxu1 %v2069_v53  ;;  %v2083_v53 = vld [vmem:[%s2419_s7 + $0x30] sm:$0xff]  }
 0x279   :  { %1844 = vmatprep.subr.bf16.mxu1 %v1843_v42 }
 0x27b   :  { %1237 = vmatmul.mubr.bf16.vlgmr.msra.gmra.mrb[8].mxu1 %v1058_v38 }
 0x27c   :  { %1326 = vmatprep.mubr.f32.mxu1 %v2146_v44  ;;  %1846 = vmatpush1.bf16.msra.mxu1 %v1845_v45 }
 0x27d   :  { %1848 = vmatprep.subr.bf16.mxu1 %v1843_v42 }
 0x32e   :  { %v1793_v46 = vpop.f32.mrb[4].mxu1 }
 0x32f   :  { %v1794_v47 = vpop.f32.mrb[5].mxu1 }
 0x330   :  { %v1795_v48 = vadd.f32 %v1794_v47, %v1793_v46  ;;  %v1796_v49 = vpop.f32.mrb[6].mxu1 }
 0x331   :  { %v1797_v50 = vpop.f32.mrb[7].mxu1 }
 0x332   :  { %v1197_v62 = vsel %vm1196_vm0, %v1795_v48, 0.0 }
 0x333   :  { %v1198_v63 = vrot.slane %v1197_v62, 4 }
 0x335   :  { %v1199_v0 = vadd.f32 %v1198_v63, %v1197_v62 }
 0x337   :  { %v1200_v1 = vrot.slane %v1199_v0, 2 }
 0x339   :  { %v1201_v6 = vadd.f32 %v1200_v1, %v1199_v0 }
 0x33b   :  { %v1202_v10 = vrot.slane %v1201_v6, 1 }
 0x33d   :  { %v1203_v13 = vadd.f32 %v1202_v10, %v1201_v6 }
 0x33f   :  { %v1251_v16 = vmul.f32 %v1203_v13, %v1203_v13 }
 0x34e   :  { %v1815_v2 = vpop.f32.mrb[8].mxu1 }
 0x34f   :  { %v1816_v3 = vpop.f32.mrb[9].mxu1 }
 0x350   :  { %v1817_v4 = vadd.f32 %v1816_v3, %v1815_v2  ;;  %v1818_v5 = vpop.f32.mrb[10].mxu1 }
 0x351   :  { %v1819_v7 = vpop.f32.mrb[11].mxu1 }
 0x352   :  { %v1244_v8 = vsel %vm1196_vm0, %v1817_v4, 0.0 }
 0x353   :  { %v1245_v9 = vrot.slane %v1244_v8, 4 }
 0x355   :  { %v1246_v11 = vadd.f32 %v1245_v9, %v1244_v8 }
 0x357   :  { %v1247_v12 = vrot.slane %v1246_v11, 2 }
 0x359   :  { %v1248_v14 = vadd.f32 %v1247_v12, %v1246_v11 }
 0x35b   :  { %v1249_v15 = vrot.slane %v1248_v14, 1 }
 0x35d   :  { %v1250_v17 = vadd.f32 %v1249_v15, %v1248_v14 }
 0x35f   :  { %v1252_v18 = vsub.f32 %v1250_v17, %v1251_v16 }
 0x361   :  { %v1253_v19 = vadd.f32 1e-05, %v1252_v18 }
 0x363   :  { %2086 = vrsqrt.f32 %v1253_v19 }
 0x36d   :  { %v2087_v21 = vpop.eup %2086 }
 0x36e   :  { %v1255_v22 = vmul.f32 %v2087_v21, %v1052_v20 }
 0x370   :  { %1759 = vmatmul.mubr.msk.f32.vlgmr.msra.gmra.mrb[12].mxu1 %vm1258_vm1, %v1255_v22  ;;  %v1256_v25 = vmul.f32 %v1255_v22, %v1203_v13 }
 0x371   :  { %1850 = vmatpush1.bf16.msra.mxu1 %v1845_v45  ;;  %1400 = vmatprep.mubr.f32.mxu1 %v2146_v44 }
 0x372   :  { %v1257_v27 = vsub.f32 %v1053_v24, %v1256_v25  ;;  %1821 = vmatprep.subr.bf16.mxu1 %v2070_v23 }
 0x374   :  { %1760 = vmatmul.mubr.msk.f32.vlgmr.msra.gmra.mrb[14].mxu1 %vm1258_vm1, %v1257_v27 }
 0x375   :  { %1822 = vmatpush3.bf16.msra.mxu1 %v2071_v26 }
 0x376   :  { %1823 = vmatprep.subr.bf16.mxu1 %v2072_v28 }
 0x379   :  { %1824 = vmatpush3.bf16.msra.mxu1 %v2073_v29 }
 0x37a   :  { %1825 = vmatprep.subr.bf16.mxu1 %v2074_v30 }
 0x37d   :  { %1826 = vmatpush3.bf16.msra.mxu1 %v2075_v31 }
 0x37e   :  { %1827 = vmatprep.subr.bf16.mxu1 %v2076_v32 }
 0x381   :  { %1828 = vmatpush3.bf16.msra.mxu1 %v2077_v33 }
 0x382   :  { %1829 = vmatprep.subr.bf16.mxu1 %v2078_v34 }
 0x385   :  { %1830 = vmatpush3.bf16.msra.mxu1 %v2079_v35 }
 0x386   :  { %1831 = vmatprep.subr.bf16.mxu1 %v2080_v36 }
 0x389   :  { %1832 = vmatpush3.bf16.msra.mxu1 %v2081_v51 }
 0x38a   :  { %1833 = vmatprep.subr.bf16.mxu1 %v2082_v52 }
 0x38d   :  { %1834 = vmatpush3.bf16.msra.mxu1 %v2083_v53 }
 0x38e   :  { %1835 = vmatprep.subr.bf16.mxu1 %v2084_v56 }
 0x391   :  { %1836 = vmatpush3.bf16.msra.mxu1 %v2085_v57 }
 0x443   :  { %v1328_v61 = vpop.f32.mrb[12].mxu1 }
 0x444   :  { %v1410_v37 = vrot.slane %v1328_v61, %v1409_v60  ;;  %v1330_v38 = vpop.f32.mrb[13].mxu1 }
 0x445   :  { %v1414_v39 = vrot.slane %v1330_v38, %v1409_v60 }
 0x446   :  { %v1415_v40 = vmul.f32 %v1410_v37, %v2316_v54 }
 0x447   :  { %v1416_v41 = vmul.f32 %v1414_v39, %v2318_v55  ;;  %v1402_v42 = vpop.f32.mrb[14].mxu1 }
 0x448   :  { %v1420_v43 = vrot.slane %v1402_v42, %v1409_v60  ;;  %v1404_v44 = vpop.f32.mrb[15].mxu1 }
 0x449   :  { %v1424_v45 = vrot.slane %v1404_v44, %v1409_v60 }
 0x44a   :  { %v1425_v46 = vadd.f32 %v1420_v43, %v1415_v40 }
 0x44b   :  { %v1426_v47 = vadd.f32 %v1424_v45, %v1416_v41 }
 0x44c   :  { %v1427_v48 = vmul.f32 0.2, %v1425_v46 }
 0x44d   :  { %v1428_v49 = vmul.f32 0.2, %v1426_v47 }
 0x44e   :  { %v1429_v50 = vmax.f32 %v1425_v46, %v1427_v48 }
 0x44f   :  { %v1430_v62 = vmax.f32 %v1426_v47, %v1428_v49 }
 0x450   :  { %v1463_v0 = vpack.c.bf16 %v1429_v50, %v1429_v50 }
 0x451   :  { %v1464_v63 = vpack.c.bf16 %v1430_v62, %v1430_v62 }
 0x453   :  { %1593 = vmatprep.mubr.bf16.mxu1 %v1464_v63 }
 0x454   :  { %1594 = vmatmul.mubr.bf16.vlgmr.msra.gmra.mrb[16].mxu1 %v1463_v0 }
 0x527   :  { %v1837_v1 = vpop.f32.mrb[16].mxu1 }
 0x528   :  { %v1838_v2 = vpop.f32.mrb[17].mxu1 }
 0x529   :  { %v1839_v3 = vadd.f32 %v1838_v2, %v1837_v1  ;;  %v1840_v54 = vpop.f32.mrb[18].mxu1 }
 0x52a   :  { %v1841_v4 = vpop.f32.mrb[19].mxu1 }
 0x52b   :  { %v1601_v55 = vsub.f32 0.0, %v1839_v3 }
 0x52d   :  { %v1602_v5 = vmul.f32 1.442695, %v1601_v55 }
 0x52f   :  { %2088 = vpow2.f32 %v1602_v5 }
 0x539   :  { %v2089_v6 = vpop.eup %2088 }
 0x53a   :  { %v1604_v7 = vadd.f32 1.0, %v2089_v6 }
 0x53c   :  { %2090 = vrcp.f32 %v1604_v7 }
 0x546   :  { %v2091_v8 = vpop.eup %2090 }
 0x547   :  { %1607 = vst [vmem:[%s2420_s8] sm:$0x3] %v2091_v8 }
 0x548   :  { %1612 = vsyncpa [#allocation3], 1 }
 0x549   :  { %1613 = vsyncpa [#allocation5], 1 }

</bundles_post_ra>
